<compile_context>
chip_gen: v7x
topology: tpu7x:2x2x1
jax: 0.10.0
libtpu: 0.0.40
codegen_flags: <defaults>
</compile_context>

<pallas_src>
import jax
import jax.numpy as jnp
from jax.experimental import pallas as pl
from jax.experimental.pallas import tpu as pltpu

H_PAD = 128  # padded hidden width: every intermediate is a full 128-lane vreg


def mlp_kernel(x_ref, w1_ref, b1_ref, w2_ref, b2_ref, w34_ref, b34_ref, o_ref):
    wt = w1_ref.dtype  # matmul-operand dtype (f32 or bf16); accumulation is always f32
    x = x_ref[...]

    # fc1 + ReLU   (dropout is identity at inference)
    h = jnp.dot(x, w1_ref[...], preferred_element_type=jnp.float32) + b1_ref[...]
    h = jnp.maximum(h, 0.0)
    # TODO(synk): training-mode dropout (p=0.1) would need pltpu.prng_seed +
    # pltpu.prng_random_bits masking; eval-mode forward is the identity.

    # fc2 + (dropout) + ReLU   (bias add / ReLU stay f32: no bf16 VPU on v5e)
    h = jnp.dot(h.astype(wt), w2_ref[...], preferred_element_type=jnp.float32) + b2_ref[...]
    h = jnp.maximum(h, 0.0)

    # fc3 and fc4 folded into a single linear (no activation between them)
    o = jnp.dot(h.astype(wt), w34_ref[...], preferred_element_type=jnp.float32) + b34_ref[...]
    o_ref[...] = o.astype(o_ref.dtype)


def _choose_tile_b(B):
    """Largest lane-aligned batch tile that still leaves >= 2 grid steps
    (so both v7x TensorCores get work); tiny batches use one sublane-aligned tile."""
    for t in (2048, 1024, 512, 256, 128):
        if B >= 2 * t:
            return t
    if B > 128:
        return 128
    return max(8, ((B + 7) // 8) * 8)


def simple_nn_forward(x, packed_params, out_size, *, tile_b=None):
    """x: (B, F); packed_params from pack_params(); returns (B, out_size) float32."""
    w1, b1, w2, b2, w34, b34 = packed_params
    B, F = x.shape

    if x.dtype != w1.dtype:
        # For peak HBM efficiency the caller should already supply x in the packed
        # dtype (bf16 on v6e/v7x); this cast is a convenience fallback.
        x = x.astype(w1.dtype)

    if tile_b is None:
        tile_b = _choose_tile_b(B)
    num_tiles = pl.cdiv(B, tile_b)
    b_pad = num_tiles * tile_b
    if b_pad != B:  # only materialize a padded copy when strictly necessary
        x = jnp.pad(x, ((0, b_pad - B), (0, 0)))

    # Weights / biases: constant block index -> DMA'd once, stay VMEM-resident.
    const = lambda arr: pl.BlockSpec(arr.shape, lambda i: (0, 0))

    flops = 2 * b_pad * (F * H_PAD + H_PAD * H_PAD + H_PAD * out_size)
    bytes_accessed = (x.size * x.dtype.itemsize
                      + sum(int(a.size) * a.dtype.itemsize for a in packed_params)
                      + b_pad * out_size * 4)

    out = pl.pallas_call(
        mlp_kernel,
        out_shape=jax.ShapeDtypeStruct((b_pad, out_size), jnp.float32),
        grid=(num_tiles,),
        in_specs=[
            pl.BlockSpec((tile_b, F), lambda i: (i, 0)),   # x: tiled over batch
            const(w1), const(b1),
            const(w2), const(b2),
            const(w34), const(b34),
        ],
        # Narrow (tile_b, out_size) output block: the HBM writeback moves only the
        # real out_size columns; the masked in-VMEM store is negligible compute.
        out_specs=pl.BlockSpec((tile_b, out_size), lambda i: (i, 0)),
        compiler_params=pltpu.CompilerParams(dimension_semantics=("parallel",)),
        cost_estimate=pl.CostEstimate(flops=int(flops), transcendentals=0,
                                      bytes_accessed=int(bytes_accessed)),
    )(x, w1, b1, w2, b2, w34, b34)

    return out if b_pad == B else out[:B]


def init_raw_params(key, input_size, hidden_size, output_size):
    """Deterministic init mimicking nn.Linear's uniform(-1/sqrt(fan_in), +1/sqrt(fan_in)).
    Weights stored pre-transposed as (in_features, out_features)."""
    ks = jax.random.split(key, 8)

    def linear(kw, kb, fan_in, fan_out):
        bound = 1.0 / jnp.sqrt(jnp.float32(fan_in))
        w = jax.random.uniform(kw, (fan_in, fan_out), jnp.float32, -bound, bound)
        b = jax.random.uniform(kb, (1, fan_out), jnp.float32, -bound, bound)
        return w, b

    w1, b1 = linear(ks[0], ks[1], input_size, hidden_size)
    w2, b2 = linear(ks[2], ks[3], hidden_size, hidden_size)
    w3, b3 = linear(ks[4], ks[5], hidden_size, hidden_size)
    w4, b4 = linear(ks[6], ks[7], hidden_size, output_size)
    return (w1, b1, w2, b2, w3, b3, w4, b4)


def pack_params(raw_params, *, dtype=jnp.float32, hidden_pad=H_PAD):
    """Fold fc3/fc4, zero-pad the hidden dim to 128 lanes, cast weights to `dtype`.
    Biases stay f32 (post-matmul elementwise math runs in f32 on every chip).
    The output dim is NOT padded (lane-dense output padding was pure wasted HBM traffic)."""
    w1, b1, w2, b2, w3, b3, w4, b4 = raw_params
    in_f, hidden = w1.shape
    out_size = w4.shape[1]
    assert hidden <= hidden_pad, "hidden_size must be <= 128 for this kernel"
    assert out_size <= 128, "output_size must be <= 128 for this kernel"

    # Fold: (h @ w3 + b3) @ w4 + b4 == h @ (w3 @ w4) + (b3 @ w4 + b4)
    w34 = w3 @ w4            # (hidden, out)
    b34 = b3 @ w4 + b4       # (1, out)

    def pad2(a, rows, cols):
        return jnp.pad(a, ((0, rows - a.shape[0]), (0, cols - a.shape[1])))

    w1_p = pad2(w1, in_f, hidden_pad).astype(dtype)
    b1_p = pad2(b1, 1, hidden_pad)                    # zero bias on pad lanes -> relu(0)=0
    w2_p = pad2(w2, hidden_pad, hidden_pad).astype(dtype)
    b2_p = pad2(b2, 1, hidden_pad)
    w34_p = pad2(w34, hidden_pad, out_size).astype(dtype)
    b34_p = b34                                       # (1, out_size), f32
    return (w1_p, b1_p, w2_p, b2_p, w34_p, b34_p)


def reference_forward(x, raw_params):
    """Pure-JAX reference of the original (un-folded, un-padded) module in eval mode."""
    w1, b1, w2, b2, w3, b3, w4, b4 = raw_params
    h = jnp.maximum(x @ w1 + b1, 0.0)
    h = jnp.maximum(h @ w2 + b2, 0.0)
    h = h @ w3 + b3
    return h @ w4 + b4


if __name__ == "__main__":
    # Small shapes consistent with the module: input_size = num_input_variables,
    # hidden_size = 10, output_size = 1.
    batch, input_size, hidden_size, output_size = 8, 8, 10, 1

    key = jax.random.PRNGKey(0)
    k_x, k_p = jax.random.split(key)
    x = jax.random.normal(k_x, (batch, input_size), jnp.float32)

    raw_params = init_raw_params(k_p, input_size, hidden_size, output_size)
    ref = reference_forward(x, raw_params)

    # f32 path — matches the PyTorch-style reference to tight tolerance
    # (fc3*fc4 folding changes f32 rounding order slightly).
    out_f32 = simple_nn_forward(x, pack_params(raw_params, dtype=jnp.float32), output_size)
    out_f32 = jax.block_until_ready(out_f32)
    assert out_f32.shape == (batch, output_size)
    assert jnp.allclose(out_f32, ref, atol=5e-5, rtol=5e-5), "f32 mismatch vs reference"

    # bf16 matmul-operand path (recommended on v6e/v7x: halves x/weight HBM reads,
    # native-rate MXU; accumulation + bias/ReLU remain f32).
    params_bf16 = pack_params(raw_params, dtype=jnp.bfloat16)
    out_bf16 = simple_nn_forward(x.astype(jnp.bfloat16), params_bf16, output_size)
    out_bf16 = jax.block_until_ready(out_bf16)
    assert out_bf16.shape == (batch, output_size)
    assert jnp.allclose(out_bf16, ref, atol=5e-2, rtol=5e-2), "bf16 mismatch vs reference"

    print("KERNEL_OK")
</pallas_src>

<mosaic_0001>
module attributes {stable_mosaic.version = 11 : i64} {
  func.func @mlp_kernel(%arg0: i32, %arg1: memref<8x8xf32, #tpu.memory_space<vmem>>, %arg2: memref<8x128xf32, #tpu.memory_space<vmem>>, %arg3: memref<1x128xf32, #tpu.memory_space<vmem>>, %arg4: memref<128x128xf32, #tpu.memory_space<vmem>>, %arg5: memref<1x128xf32, #tpu.memory_space<vmem>>, %arg6: memref<128x1xf32, #tpu.memory_space<vmem>>, %arg7: memref<1x1xf32, #tpu.memory_space<vmem>>, %arg8: memref<8x1xf32, #tpu.memory_space<vmem>>) attributes {dimension_semantics = [#tpu.dimension_semantics<parallel>], iteration_bounds = array<i64: 1>, scalar_prefetch = 0 : i64, scratch_operands = 0 : i64, tpu.core_type = #tpu.core_type<tc>, window_params = [{transform_indices = @transform_0, window_bounds = array<i64: 8, 8>}, {pipeline_mode = #tpu.pipeline_mode<synchronous>, transform_indices = @transform_1, window_bounds = array<i64: 8, 128>}, {pipeline_mode = #tpu.pipeline_mode<synchronous>, transform_indices = @transform_2, window_bounds = array<i64: 1, 128>}, {pipeline_mode = #tpu.pipeline_mode<synchronous>, transform_indices = @transform_3, window_bounds = array<i64: 128, 128>}, {pipeline_mode = #tpu.pipeline_mode<synchronous>, transform_indices = @transform_4, window_bounds = array<i64: 1, 128>}, {pipeline_mode = #tpu.pipeline_mode<synchronous>, transform_indices = @transform_5, window_bounds = array<i64: 128, 1>}, {pipeline_mode = #tpu.pipeline_mode<synchronous>, transform_indices = @transform_6, window_bounds = array<i64: 1, 1>}, {transform_indices = @transform_7, window_bounds = array<i64: 8, 1>}]} {
    %c0 = arith.constant 0 : index
    %c0_0 = arith.constant 0 : index
    %0 = vector.load %arg1[%c0, %c0_0] : memref<8x8xf32, #tpu.memory_space<vmem>>, vector<8x8xf32>
    %c0_1 = arith.constant 0 : index
    %c0_2 = arith.constant 0 : index
    %1 = vector.load %arg2[%c0_1, %c0_2] : memref<8x128xf32, #tpu.memory_space<vmem>>, vector<8x128xf32>
    %cst = arith.constant dense<0.000000e+00> : vector<8x128xf32>
    %2 = tpu.matmul %0, %1, %cst {dimension_numbers = #tpu.dot_dimension_numbers<[1], [0], [0], [1], [0, 0, 1, 1], [], []>} : vector<8x8xf32>, vector<8x128xf32>, vector<8x128xf32> -> vector<8x128xf32>
    %c0_3 = arith.constant 0 : index
    %c0_4 = arith.constant 0 : index
    %3 = vector.load %arg3[%c0_3, %c0_4] : memref<1x128xf32, #tpu.memory_space<vmem>>, vector<1x128xf32>
    %4 = vector.broadcast %3 : vector<1x128xf32> to vector<8x128xf32>
    %5 = arith.addf %2, %4 : vector<8x128xf32>
    %cst_5 = arith.constant 0.000000e+00 : f32
    %6 = vector.broadcast %cst_5 : f32 to vector<8x128xf32>
    %7 = arith.maximumf %5, %6 : vector<8x128xf32>
    %c0_6 = arith.constant 0 : index
    %c0_7 = arith.constant 0 : index
    %8 = vector.load %arg4[%c0_6, %c0_7] : memref<128x128xf32, #tpu.memory_space<vmem>>, vector<128x128xf32>
    %cst_8 = arith.constant dense<0.000000e+00> : vector<8x128xf32>
    %9 = tpu.matmul %7, %8, %cst_8 {dimension_numbers = #tpu.dot_dimension_numbers<[1], [0], [0], [1], [0, 0, 1, 1], [], []>} : vector<8x128xf32>, vector<128x128xf32>, vector<8x128xf32> -> vector<8x128xf32>
    %c0_9 = arith.constant 0 : index
    %c0_10 = arith.constant 0 : index
    %10 = vector.load %arg5[%c0_9, %c0_10] : memref<1x128xf32, #tpu.memory_space<vmem>>, vector<1x128xf32>
    %11 = vector.broadcast %10 : vector<1x128xf32> to vector<8x128xf32>
    %12 = arith.addf %9, %11 : vector<8x128xf32>
    %cst_11 = arith.constant 0.000000e+00 : f32
    %13 = vector.broadcast %cst_11 : f32 to vector<8x128xf32>
    %14 = arith.maximumf %12, %13 : vector<8x128xf32>
    %c0_12 = arith.constant 0 : index
    %c0_13 = arith.constant 0 : index
    %15 = vector.load %arg6[%c0_12, %c0_13] : memref<128x1xf32, #tpu.memory_space<vmem>>, vector<128x1xf32>
    %cst_14 = arith.constant dense<0.000000e+00> : vector<8x1xf32>
    %16 = tpu.matmul %14, %15, %cst_14 {dimension_numbers = #tpu.dot_dimension_numbers<[1], [0], [0], [1], [0, 0, 1, 1], [], []>} : vector<8x128xf32>, vector<128x1xf32>, vector<8x1xf32> -> vector<8x1xf32>
    %c0_15 = arith.constant 0 : index
    %c0_16 = arith.constant 0 : index
    %17 = vector.load %arg7[%c0_15, %c0_16] : memref<1x1xf32, #tpu.memory_space<vmem>>, vector<1x1xf32>
    %18 = vector.broadcast %17 : vector<1x1xf32> to vector<8x1xf32>
    %19 = arith.addf %16, %18 : vector<8x1xf32>
    %c0_17 = arith.constant 0 : index
    %c0_18 = arith.constant 0 : index
    %20 = vector.load %arg8[%c0_17, %c0_18] : memref<8x1xf32, #tpu.memory_space<vmem>>, vector<8x1xf32>
    tpu.vector_store %arg8[%c0_17, %c0_18], %19 {strides = array<i32>} : memref<8x1xf32, #tpu.memory_space<vmem>>, vector<8x1xf32>,
    return
  }
  func.func @transform_0(%arg0: i32) -> (i32, i32) {
    %c0_i32 = arith.constant 0 : i32
    %c0_i32_0 = arith.constant 0 : i32
    return %arg0, %c0_i32 : i32, i32
  }
  func.func @transform_1(%arg0: i32) -> (i32, i32) {
    %c0_i32 = arith.constant 0 : i32
    %c0_i32_0 = arith.constant 0 : i32
    %c0_i32_1 = arith.constant 0 : i32
    return %c0_i32, %c0_i32_0 : i32, i32
  }
  func.func @transform_2(%arg0: i32) -> (i32, i32) {
    %c0_i32 = arith.constant 0 : i32
    %c0_i32_0 = arith.constant 0 : i32
    %c0_i32_1 = arith.constant 0 : i32
    return %c0_i32, %c0_i32_0 : i32, i32
  }
  func.func @transform_3(%arg0: i32) -> (i32, i32) {
    %c0_i32 = arith.constant 0 : i32
    %c0_i32_0 = arith.constant 0 : i32
    %c0_i32_1 = arith.constant 0 : i32
    return %c0_i32, %c0_i32_0 : i32, i32
  }
  func.func @transform_4(%arg0: i32) -> (i32, i32) {
    %c0_i32 = arith.constant 0 : i32
    %c0_i32_0 = arith.constant 0 : i32
    %c0_i32_1 = arith.constant 0 : i32
    return %c0_i32, %c0_i32_0 : i32, i32
  }
  func.func @transform_5(%arg0: i32) -> (i32, i32) {
    %c0_i32 = arith.constant 0 : i32
    %c0_i32_0 = arith.constant 0 : i32
    %c0_i32_1 = arith.constant 0 : i32
    return %c0_i32, %c0_i32_0 : i32, i32
  }
  func.func @transform_6(%arg0: i32) -> (i32, i32) {
    %c0_i32 = arith.constant 0 : i32
    %c0_i32_0 = arith.constant 0 : i32
    %c0_i32_1 = arith.constant 0 : i32
    return %c0_i32, %c0_i32_0 : i32, i32
  }
  func.func @transform_7(%arg0: i32) -> (i32, i32) {
    %c0_i32 = arith.constant 0 : i32
    %c0_i32_0 = arith.constant 0 : i32
    return %arg0, %c0_i32 : i32, i32
  }
}

</mosaic_0001>

<bundles_post_ra>
// kernel: tpu_custom_call.1
= control target key start
LH: loop header
LB: loop body
LE: loop exit
PB: predicated region body
PF: predicated region fallthrough
CT: control target
= control target key end

     0   :  { %s695_s0 = inlined_call_operand.vmem [shape: f32[8,8], index: 0, kind: input, shape index: {}]   ;;  %s696_s1 = inlined_call_operand.vmem [shape: f32[8,128], index: 1, kind: input, shape index: {}]   ;;  %s697_s2 = inlined_call_operand.hbm [shape: f32[1,128], index: 2, kind: input, shape index: {}]   ;;  %s698_s3 = inlined_call_operand.vmem [shape: f32[128,128], index: 3, kind: input, shape index: {}]   ;;  %s699_s4 = inlined_call_operand.vmem [shape: f32[1,128], index: 4, kind: input, shape index: {}]   ;;  %s700_s5 = inlined_call_operand.vmem [shape: f32[128,1], index: 5, kind: input, shape index: {}]   ;;  %s701_s6 = inlined_call_operand.<no memory space> [shape: f32[1,1], index: 6, kind: input, shape index: {}]   ;;  %s702_s7 = inlined_call_operand.vmem [shape: f32[8,1], index: 7, kind: output, shape index: {}]  }
   0x1   :  { %v12_v0 = vstv %s701_s6 }
   0x2   :  { %13 = vst [vmem:[#allocation2] sm:$0x1] %v12_v0 }
   0x3   :  { %14 = vsyncpa [#allocation4], 0  ;;  %s509_s26 = smov [#allocation3]   ;;  %s485_s30 = scalar_lea.hbm %s697_s2, 16 }
   0x4   :  { %s25_s27 = sshll.u32 %s509_s26, 4  ;;  %p486_p0 = scmp.ne.s32.totalorder %s697_s2, %s485_s30  ;;  %s26_s27 = int_to_ptr.vmem [resolvable:$true] %s25_s27 }
   0x5   :  { %p489_p1 = scmp.lt.u32.totalorder %s485_s30, %s697_s2 }
   0x7   :  { %p491_p2 = pnand %p489_p1, %p486_p0 }
   0x9   :  { %494 = shalt.err (!%p491_p2)
}
   0xa   :  { %s495_s6 = scalar_lea.vmem %s26_s27, 16  ;;  %s499_s12 = scalar_lea.vmem %s26_s27, 32 }
   0xb   :  { %p496_p3 = scmp.ne.s32.totalorder %s26_s27, %s495_s6  ;;  %p500_p4 = scmp.lt.s32.totalorder %s26_s27, %s26_s27 }
   0xc   :  { %p501_p5 = scmp.lt.s32.totalorder %s499_s12, %s495_s6 }
   0xe   :  { %p502_p6 = por %p501_p5, %p500_p4 }
  0x10   :  { %p503_p7 = pnand %p502_p6, %p496_p3 }
  0x12   :  { %506 = shalt.err (!%p503_p7)
}
  0x13   :  { %28 = dma.hbm_to_vmem [thread:$0]  %s697_s2, 16, %s26_s27, [#allocation4]  }
  0x14   :  { %507 = dma.done.wait [#allocation4], 16  }
  0x15   :  { %508 = vsyncadd [#allocation4], 4294967280  ;;  %v510_v1 = vmov 0.0   ;;  %vm511_vm0 = vmmov 0   ;;  %v512_v2 = vmov 0.0|0.0   ;;  %vm49_vm1 = vcmask 64512  }
  0x16   :  { %358 = vmatprep.subr.mxu0 %v510_v1  ;;  %360 = vmatprep.mubr.msk.f32.mxu0 %vm511_vm0, %v510_v1  ;;  %v41_v3 = vld [vmem:[%s696_s1] sm:$0xff]  ;;  %v125_v6 = vld [vmem:[%s698_s3 + $0x8] sm:$0xff]  ;;  %v126_v7 = vld [vmem:[%s698_s3 + $0x10] sm:$0xff]  ;;  %vm311_vm2 = vcmask 7168  }
  0x17   :  { %433 = vmatprep.subr.bf16.mxu1 %v512_v2  ;;  %395 = vmatprep.mubr.msk.f32.mxu1 %vm511_vm0, %v510_v1  ;;  %v40_v4 = vld [vmem:[%s695_s0] sm:$0xff]  ;;  %v127_v8 = vld [vmem:[%s698_s3 + $0x18] sm:$0xff]  ;;  %v129_v12 = vld [vmem:[%s698_s3 + $0x28] sm:$0xff] }
  0x18   :  { %v124_v5 = vld [vmem:[%s698_s3] sm:$0xff]  ;;  %359 = vmatpush3.msra.mxu0 %v41_v3  ;;  %v437_v10 = vpack.c.bf16 %v127_v8, %v126_v7  ;;  %v130_v14 = vld [vmem:[%s698_s3 + $0x30] sm:$0xff]  ;;  %v131_v15 = vld [vmem:[%s698_s3 + $0x38] sm:$0xff] }
  0x19   :  { %361 = vmatmul.mubr.msk.f32.vlgmr.msra.gmra.mrb[0].mxu0 %vm49_vm1, %v40_v4  ;;  %v434_v9 = vpack.c.bf16 %v125_v6, %v124_v5  ;;  %457 = vmatprep.subr.bf16.mxu0 %v512_v2  ;;  %v128_v11 = vld [vmem:[%s698_s3 + $0x20] sm:$0xff]  ;;  %v443_v16 = vpack.c.bf16 %v131_v15, %v130_v14  ;;  %v133_v18 = vld [vmem:[%s698_s3 + $0x48] sm:$0xff]  ;;  %v134_v20 = vld [vmem:[%s698_s3 + $0x50] sm:$0xff] }
  0x1a   :  { %430 = vmatprep.mubr.msk.f32.mxu0 %vm511_vm0, %v510_v1  ;;  %v440_v13 = vpack.c.bf16 %v129_v12, %v128_v11  ;;  %v132_v17 = vld [vmem:[%s698_s3 + $0x40] sm:$0xff]  ;;  %v135_v21 = vld [vmem:[%s698_s3 + $0x58] sm:$0xff]  ;;  %v137_v24 = vld [vmem:[%s698_s3 + $0x68] sm:$0xff] }
  0x1b   :  { %435 = vmatpush3.bf16.msra.mxu1 %v434_v9  ;;  %v446_v19 = vpack.c.bf16 %v133_v18, %v132_v17  ;;  %v449_v22 = vpack.c.bf16 %v135_v21, %v134_v20  ;;  %v136_v23 = vld [vmem:[%s698_s3 + $0x60] sm:$0xff]  ;;  %v138_v26 = vld [vmem:[%s698_s3 + $0x70] sm:$0xff]  ;;  %v139_v27 = vld [vmem:[%s698_s3 + $0x78] sm:$0xff] }
  0x1c   :  { %436 = vmatprep.subr.bf16.mxu1 %v512_v2  ;;  %v452_v25 = vpack.c.bf16 %v137_v24, %v136_v23  ;;  %v455_v28 = vpack.c.bf16 %v139_v27, %v138_v26  ;;  %v218_v29 = vld [vmem:[%s700_s5] sm:$0xff]  ;;  %v219_v30 = vld [vmem:[%s700_s5 + $0x8] sm:$0xff]  ;;  %v220_v31 = vld [vmem:[%s700_s5 + $0x10] sm:$0xff] }
  0x1d   :  { %v458_v32 = vpack.c.bf16 %v219_v30, %v218_v29  ;;  %v221_v33 = vld [vmem:[%s700_s5 + $0x18] sm:$0xff]  ;;  %v222_v35 = vld [vmem:[%s700_s5 + $0x20] sm:$0xff]  ;;  %v223_v36 = vld [vmem:[%s700_s5 + $0x28] sm:$0xff] }
  0x1e   :  { %v461_v34 = vpack.c.bf16 %v221_v33, %v220_v31  ;;  %v464_v37 = vpack.c.bf16 %v223_v36, %v222_v35  ;;  %v224_v38 = vld [vmem:[%s700_s5 + $0x30] sm:$0xff]  ;;  %v225_v39 = vld [vmem:[%s700_s5 + $0x38] sm:$0xff]  ;;  %v226_v41 = vld [vmem:[%s700_s5 + $0x40] sm:$0xff] }
  0x1f   :  { %438 = vmatpush3.bf16.msra.mxu1 %v437_v10  ;;  %459 = vmatpush3.bf16.msra.mxu0 %v458_v32  ;;  %v467_v40 = vpack.c.bf16 %v225_v39, %v224_v38  ;;  %v227_v42 = vld [vmem:[%s700_s5 + $0x48] sm:$0xff]  ;;  %v228_v44 = vld [vmem:[%s700_s5 + $0x50] sm:$0xff]  ;;  %v229_v45 = vld [vmem:[%s700_s5 + $0x58] sm:$0xff] }
  0x20   :  { %439 = vmatprep.subr.bf16.mxu1 %v512_v2  ;;  %460 = vmatprep.subr.bf16.mxu0 %v512_v2  ;;  %v470_v43 = vpack.c.bf16 %v227_v42, %v226_v41  ;;  %v473_v46 = vpack.c.bf16 %v229_v45, %v228_v44  ;;  %v230_v47 = vld [vmem:[%s700_s5 + $0x60] sm:$0xff]  ;;  %v231_v48 = vld [vmem:[%s700_s5 + $0x68] sm:$0xff]  ;;  %v232_v55 = vld [vmem:[%s700_s5 + $0x70] sm:$0xff] }
  0x21   :  { %v476_v49 = vpack.c.bf16 %v231_v48, %v230_v47  ;;  %v318_v50 = vld [vmem:[#allocation3] ss:$0 sm:$0xff]  ;;  %v233_v56 = vld [vmem:[%s700_s5 + $0x78] sm:$0xff]  ;;  %v320_v58 = vld [vmem:[%s699_s4] ss:$0 sm:$0xff] }
  0x22   :  { %v479_v57 = vpack.c.bf16 %v233_v56, %v232_v55  ;;  %v321_v63 = vld [vmem:[#allocation2] ss:$0 sm:$0xff] }
  0x23   :  { %441 = vmatpush3.bf16.msra.mxu1 %v440_v13  ;;  %462 = vmatpush3.bf16.msra.mxu0 %v461_v34 }
  0x24   :  { %442 = vmatprep.subr.bf16.mxu1 %v512_v2  ;;  %463 = vmatprep.subr.bf16.mxu0 %v512_v2 }
  0x27   :  { %444 = vmatpush3.bf16.msra.mxu1 %v443_v16  ;;  %465 = vmatpush3.bf16.msra.mxu0 %v464_v37 }
  0x28   :  { %445 = vmatprep.subr.bf16.mxu1 %v512_v2  ;;  %466 = vmatprep.subr.bf16.mxu0 %v512_v2 }
  0x2b   :  { %447 = vmatpush3.bf16.msra.mxu1 %v446_v19  ;;  %468 = vmatpush3.bf16.msra.mxu0 %v467_v40 }
  0x2c   :  { %448 = vmatprep.subr.bf16.mxu1 %v512_v2  ;;  %469 = vmatprep.subr.bf16.mxu0 %v512_v2 }
  0x2f   :  { %450 = vmatpush3.bf16.msra.mxu1 %v449_v22  ;;  %471 = vmatpush3.bf16.msra.mxu0 %v470_v43 }
  0x30   :  { %451 = vmatprep.subr.bf16.mxu1 %v512_v2  ;;  %472 = vmatprep.subr.bf16.mxu0 %v512_v2 }
  0x33   :  { %453 = vmatpush3.bf16.msra.mxu1 %v452_v25  ;;  %474 = vmatpush3.bf16.msra.mxu0 %v473_v46 }
  0x34   :  { %454 = vmatprep.subr.bf16.mxu1 %v512_v2  ;;  %475 = vmatprep.subr.bf16.mxu0 %v512_v2 }
  0x37   :  { %456 = vmatpush3.bf16.msra.mxu1 %v455_v28  ;;  %477 = vmatpush3.bf16.msra.mxu0 %v476_v49 }
  0x38   :  { %478 = vmatprep.subr.bf16.mxu0 %v512_v2 }
  0x3b   :  { %480 = vmatpush3.bf16.msra.mxu0 %v479_v57 }
  0xec   :  { %v119_v51 = vpop.f32.mrb[0].mxu0 }
  0xed   :  { %v120_v52 = vadd.f32 %v318_v50, %v119_v51  ;;  %v362_v53 = vpop.f32.mrb[1].mxu0 }
  0xef   :  { %v123_v54 = vmax.f32 %v120_v52, 0.0 }
  0xf1   :  { %396 = vmatmul.mubr.f32.vlgmr.msra.gmra.mrb[0].mxu1 %v123_v54 }
 0x1c4   :  { %v213_v59 = vpop.f32.mrb[0].mxu1 }
 0x1c5   :  { %v214_v60 = vadd.f32 %v320_v58, %v213_v59  ;;  %v397_v61 = vpop.f32.mrb[1].mxu1 }
 0x1c7   :  { %v217_v62 = vmax.f32 %v214_v60, 0.0 }
 0x1c9   :  { %431 = vmatmul.mubr.f32.vlgmr.msra.gmra.mrb[2].mxu0 %v217_v62 }
 0x29c   :  { %v307_v0 = vpop.f32.mrb[2].mxu0 }
 0x29d   :  { %v308_v1 = vadd.f32 %v321_v63, %v307_v0  ;;  %v432_v2 = vpop.f32.mrb[3].mxu0 }
 0x29f   :  { %312 = vst.msk [vmem:[%s702_s7] sm:$0xff] %vm311_vm2, %v308_v1 }
 0x2a0   :  { %317 = vsyncpa [#allocation4], 1 }

</bundles_post_ra>
